<compile_context>
chip_gen: v7x
topology: tpu7x:2x2x1
jax: 0.10.0
libtpu: 0.0.40
codegen_flags: <defaults>
</compile_context>

<pallas_src>
import functools
import math

import jax
import jax.numpy as jnp
from jax.experimental import pallas as pl
from jax.experimental.pallas import tpu as pltpu


def _nt_xent_kernel(emb_i_ref, emb_j_ref, o_ref, *, inv_t):
    """emb_i_ref / emb_j_ref: (N, D) raw embeddings (VMEM);
    o_ref: (1, 1) f32 scalar loss (SMEM); inv_t: static python float 1/T."""
    xi = emb_i_ref[...].astype(jnp.float32)                    # (N, D)
    xj = emb_j_ref[...].astype(jnp.float32)                    # (N, D)

    # Row-wise L2 normalize (F.normalize dim=1, eps=1e-12 on the norm) with
    # sqrt(1/T) folded into the per-row scale, so every dot product below
    # directly yields sim / T.
    s = math.sqrt(inv_t)
    sq_i = jnp.sum(xi * xi, axis=-1, keepdims=True)            # (N, 1)
    sq_j = jnp.sum(xj * xj, axis=-1, keepdims=True)            # (N, 1)
    zi = xi * (jax.lax.rsqrt(jnp.maximum(sq_i, 1e-24)) * s)    # (N, D)
    zj = xj * (jax.lax.rsqrt(jnp.maximum(sq_j, 1e-24)) * s)    # (N, D)

    # Positive-pair logits L[i, i+N] == L[i+N, i] == <zi_row, zj_row>, in f32.
    pos = jnp.sum(zi * zj, axis=-1, keepdims=True)             # (N, 1)

    # Blockwise Gram matrix on the MXU: bf16 operands, f32 accumulation.
    zi_b = zi.astype(jnp.bfloat16)
    zj_b = zj.astype(jnp.bfloat16)
    dn = (((1,), (1,)), ((), ()))                              # contract last dims
    l_ii = jax.lax.dot_general(zi_b, zi_b, dn,
                               preferred_element_type=jnp.float32)  # (N, N)
    l_ij = jax.lax.dot_general(zi_b, zj_b, dn,
                               preferred_element_type=jnp.float32)  # (N, N)
    l_jj = jax.lax.dot_general(zj_b, zj_b, dn,
                               preferred_element_type=jnp.float32)  # (N, N)

    # Shift by inv_t (the maximum possible logit) before exp: overflow-safe for
    # small T, and the shift cancels in log(denom) - pos. After the shift the
    # excluded self-similarity term is exp(diag - inv_t) == 1 (unit-norm rows;
    # normalization/bf16 rounding perturbs this by ~1e-3 relative, well inside
    # the loss tolerance).
    e_ii = jnp.exp(l_ii - inv_t)
    e_ij = jnp.exp(l_ij - inv_t)
    e_jj = jnp.exp(l_jj - inv_t)

    # Denominators (self term removed analytically). l_jj is symmetric, so its
    # column sums equal its row sums; keeping the second-half terms as (1, N)
    # row vectors avoids any in-kernel transpose.
    den_i = (jnp.sum(e_ii, axis=1, keepdims=True)
             + jnp.sum(e_ij, axis=1, keepdims=True) - 1.0)     # (N, 1)
    den_j = (jnp.sum(e_ij, axis=0, keepdims=True)
             + jnp.sum(e_jj, axis=0, keepdims=True) - 1.0)     # (1, N)

    n = xi.shape[0]
    # Each pair's positive logit serves both anchors i and i+N.
    total = (jnp.sum(jnp.log(den_i)) + jnp.sum(jnp.log(den_j))
             - 2.0 * jnp.sum(pos - inv_t))
    o_ref[0, 0] = total / (2 * n)


class ContrastiveLossELI5Pallas:
    """Pallas TPU implementation of ContrastiveLossELI5.forward."""

    def __init__(self, batch_size, temperature=0.5, verbose=False):
        self.batch_size = int(batch_size)
        self.temperature = float(temperature)
        # TODO(synk): the torch module's verbose per-pair prints are debug-only
        # and are not replicated inside the kernel.
        self.verbose = verbose

    def __call__(self, emb_i, emb_j):
        assert emb_i.ndim == 2 and emb_i.shape == emb_j.shape
        assert emb_i.shape[0] == self.batch_size, (
            "batch_size mismatch vs. constructor contract")
        n, d = emb_i.shape

        kernel = functools.partial(_nt_xent_kernel,
                                   inv_t=1.0 / self.temperature)

        # Rough VMEM footprint: double-buffered inputs + the three (N, N) f32
        # blocks and their exp's. Only raise the scoped-VMEM limit when the
        # small default (16 MiB on v5e) would be tight; never above v7x's
        # 64 MiB physical VMEM.
        est_bytes = 4 * (2 * n * d) * 4 + 8 * (3 * n * n) * 4
        compiler_params = None
        if est_bytes > 12 * 1024 * 1024:
            compiler_params = pltpu.CompilerParams(
                vmem_limit_bytes=min(max(est_bytes, 32 << 20), 64 << 20))

        out = pl.pallas_call(
            kernel,
            out_shape=jax.ShapeDtypeStruct((1, 1), jnp.float32),
            in_specs=[
                pl.BlockSpec(memory_space=pltpu.MemorySpace.VMEM),
                pl.BlockSpec(memory_space=pltpu.MemorySpace.VMEM),
            ],
            out_specs=pl.BlockSpec(memory_space=pltpu.MemorySpace.SMEM),
            compiler_params=compiler_params,
        )(emb_i, emb_j)
        return out[0, 0]


def _reference_loss(emb_i, emb_j, temperature):
    """Plain-JAX reference mirroring the torch module's math."""
    def norm(v):
        nrm = jnp.sqrt(jnp.sum(v * v, axis=1, keepdims=True))
        return v / jnp.maximum(nrm, 1e-12)

    z = jnp.concatenate([norm(emb_i.astype(jnp.float32)),
                         norm(emb_j.astype(jnp.float32))], axis=0)
    sim = z @ z.T
    r = z.shape[0]
    n = r // 2
    logits = sim / temperature
    expl = jnp.where(jnp.eye(r, dtype=bool), 0.0, jnp.exp(logits))
    denom = jnp.sum(expl, axis=1)
    pair = (jnp.arange(r) + n) % r
    pos = logits[jnp.arange(r), pair]
    return jnp.mean(jnp.log(denom) - pos)


if __name__ == "__main__":
    key = jax.random.PRNGKey(0)
    k1, k2 = jax.random.split(key)

    batch, hidden = 8, 32
    emb_i = jax.random.normal(k1, (batch, hidden), dtype=jnp.float32)
    emb_j = jax.random.normal(k2, (batch, hidden), dtype=jnp.float32)

    loss_fn = ContrastiveLossELI5Pallas(batch_size=batch, temperature=0.5,
                                        verbose=False)
    loss = jax.block_until_ready(loss_fn(emb_i, emb_j))

    ref = _reference_loss(emb_i, emb_j, 0.5)
    # Tolerance accounts for bf16 MXU operands (f32 accumulate) and the
    # analytic diagonal removal; algorithmic errors would be O(0.1+).
    assert jnp.allclose(loss, ref, atol=1e-2, rtol=1e-2), (loss, ref)

    print("KERNEL_OK")
</pallas_src>

<mosaic_0001>
module attributes {stable_mosaic.version = 11 : i64} {
  func.func @_nt_xent_kernel(%arg0: memref<8x32xf32, #tpu.memory_space<vmem>>, %arg1: memref<8x32xf32, #tpu.memory_space<vmem>>, %arg2: memref<1x1xf32, #tpu.memory_space<smem>>) attributes {dimension_semantics = [], scalar_prefetch = 0 : i64, scratch_operands = 0 : i64, tpu.core_type = #tpu.core_type<tc>} {
    %c0 = arith.constant 0 : index
    %c0_0 = arith.constant 0 : index
    %0 = vector.load %arg0[%c0, %c0_0] : memref<8x32xf32, #tpu.memory_space<vmem>>, vector<8x32xf32>
    %c0_1 = arith.constant 0 : index
    %c0_2 = arith.constant 0 : index
    %1 = vector.load %arg1[%c0_1, %c0_2] : memref<8x32xf32, #tpu.memory_space<vmem>>, vector<8x32xf32>
    %2 = arith.mulf %0, %0 : vector<8x32xf32>
    %cst = arith.constant dense<0.000000e+00> : vector<8xf32>
    %3 = vector.multi_reduction <add>, %2, %cst [1] : vector<8x32xf32> to vector<8xf32>
    %4 = vector.shape_cast %3 : vector<8xf32> to vector<8x1xf32>
    %5 = arith.mulf %1, %1 : vector<8x32xf32>
    %cst_3 = arith.constant dense<0.000000e+00> : vector<8xf32>
    %6 = vector.multi_reduction <add>, %5, %cst_3 [1] : vector<8x32xf32> to vector<8xf32>
    %7 = vector.shape_cast %6 : vector<8xf32> to vector<8x1xf32>
    %cst_4 = arith.constant 1.000000e-24 : f32
    %8 = vector.broadcast %cst_4 : f32 to vector<8x1xf32>
    %9 = arith.maximumf %4, %8 : vector<8x1xf32>
    %10 = math.rsqrt %9 : vector<8x1xf32>
    %cst_5 = arith.constant 1.41421354 : f32
    %11 = vector.broadcast %cst_5 : f32 to vector<8x1xf32>
    %12 = arith.mulf %10, %11 : vector<8x1xf32>
    %13 = vector.broadcast %12 : vector<8x1xf32> to vector<8x32xf32>
    %14 = arith.mulf %0, %13 : vector<8x32xf32>
    %cst_6 = arith.constant 1.000000e-24 : f32
    %15 = vector.broadcast %cst_6 : f32 to vector<8x1xf32>
    %16 = arith.maximumf %7, %15 : vector<8x1xf32>
    %17 = math.rsqrt %16 : vector<8x1xf32>
    %cst_7 = arith.constant 1.41421354 : f32
    %18 = vector.broadcast %cst_7 : f32 to vector<8x1xf32>
    %19 = arith.mulf %17, %18 : vector<8x1xf32>
    %20 = vector.broadcast %19 : vector<8x1xf32> to vector<8x32xf32>
    %21 = arith.mulf %1, %20 : vector<8x32xf32>
    %22 = arith.mulf %14, %21 : vector<8x32xf32>
    %cst_8 = arith.constant dense<0.000000e+00> : vector<8xf32>
    %23 = vector.multi_reduction <add>, %22, %cst_8 [1] : vector<8x32xf32> to vector<8xf32>
    %24 = vector.shape_cast %23 : vector<8xf32> to vector<8x1xf32>
    %25 = arith.truncf %14 : vector<8x32xf32> to vector<8x32xbf16>
    %26 = arith.truncf %21 : vector<8x32xf32> to vector<8x32xbf16>
    %cst_9 = arith.constant dense<0.000000e+00> : vector<8x8xf32>
    %27 = tpu.matmul %25, %25, %cst_9 {dimension_numbers = #tpu.dot_dimension_numbers<[1], [1], [0], [0], [0, 0, 1, 0], [], []>} : vector<8x32xbf16>, vector<8x32xbf16>, vector<8x8xf32> -> vector<8x8xf32>
    %cst_10 = arith.constant dense<0.000000e+00> : vector<8x8xf32>
    %28 = tpu.matmul %25, %26, %cst_10 {dimension_numbers = #tpu.dot_dimension_numbers<[1], [1], [0], [0], [0, 0, 1, 0], [], []>} : vector<8x32xbf16>, vector<8x32xbf16>, vector<8x8xf32> -> vector<8x8xf32>
    %cst_11 = arith.constant dense<0.000000e+00> : vector<8x8xf32>
    %29 = tpu.matmul %26, %26, %cst_11 {dimension_numbers = #tpu.dot_dimension_numbers<[1], [1], [0], [0], [0, 0, 1, 0], [], []>} : vector<8x32xbf16>, vector<8x32xbf16>, vector<8x8xf32> -> vector<8x8xf32>
    %cst_12 = arith.constant 2.000000e+00 : f32
    %30 = vector.broadcast %cst_12 : f32 to vector<8x8xf32>
    %31 = arith.subf %27, %30 : vector<8x8xf32>
    %32 = math.exp %31 : vector<8x8xf32>
    %cst_13 = arith.constant 2.000000e+00 : f32
    %33 = vector.broadcast %cst_13 : f32 to vector<8x8xf32>
    %34 = arith.subf %28, %33 : vector<8x8xf32>
    %35 = math.exp %34 : vector<8x8xf32>
    %cst_14 = arith.constant 2.000000e+00 : f32
    %36 = vector.broadcast %cst_14 : f32 to vector<8x8xf32>
    %37 = arith.subf %29, %36 : vector<8x8xf32>
    %38 = math.exp %37 : vector<8x8xf32>
    %cst_15 = arith.constant dense<0.000000e+00> : vector<8xf32>
    %39 = vector.multi_reduction <add>, %32, %cst_15 [1] : vector<8x8xf32> to vector<8xf32>
    %40 = vector.shape_cast %39 : vector<8xf32> to vector<8x1xf32>
    %cst_16 = arith.constant dense<0.000000e+00> : vector<8xf32>
    %41 = vector.multi_reduction <add>, %35, %cst_16 [1] : vector<8x8xf32> to vector<8xf32>
    %42 = vector.shape_cast %41 : vector<8xf32> to vector<8x1xf32>
    %43 = arith.addf %40, %42 : vector<8x1xf32>
    %cst_17 = arith.constant 1.000000e+00 : f32
    %44 = vector.broadcast %cst_17 : f32 to vector<8x1xf32>
    %45 = arith.subf %43, %44 : vector<8x1xf32>
    %cst_18 = arith.constant dense<0.000000e+00> : vector<8xf32>
    %46 = vector.multi_reduction <add>, %35, %cst_18 [0] : vector<8x8xf32> to vector<8xf32>
    %47 = vector.shape_cast %46 : vector<8xf32> to vector<1x8xf32>
    %cst_19 = arith.constant dense<0.000000e+00> : vector<8xf32>
    %48 = vector.multi_reduction <add>, %38, %cst_19 [0] : vector<8x8xf32> to vector<8xf32>
    %49 = vector.shape_cast %48 : vector<8xf32> to vector<1x8xf32>
    %50 = arith.addf %47, %49 : vector<1x8xf32>
    %cst_20 = arith.constant 1.000000e+00 : f32
    %51 = vector.broadcast %cst_20 : f32 to vector<1x8xf32>
    %52 = arith.subf %50, %51 : vector<1x8xf32>
    %53 = math.log %45 : vector<8x1xf32>
    %54 = vector.shape_cast %53 : vector<8x1xf32> to vector<1x8x1xf32>
    %cst_21 = arith.constant dense<0.000000e+00> : vector<1xf32>
    %55 = vector.multi_reduction <add>, %54, %cst_21 [1, 2] : vector<1x8x1xf32> to vector<1xf32>
    %56 = vector.shape_cast %55 : vector<1xf32> to vector<1x1x1xf32>
    %57 = vector.extract %56[0, 0, 0] : f32 from vector<1x1x1xf32>
    %58 = math.log %52 : vector<1x8xf32>
    %59 = vector.shape_cast %58 : vector<1x8xf32> to vector<1x1x8xf32>
    %cst_22 = arith.constant dense<0.000000e+00> : vector<1xf32>
    %60 = vector.multi_reduction <add>, %59, %cst_22 [1, 2] : vector<1x1x8xf32> to vector<1xf32>
    %61 = vector.shape_cast %60 : vector<1xf32> to vector<1x1x1xf32>
    %62 = vector.extract %61[0, 0, 0] : f32 from vector<1x1x1xf32>
    %63 = arith.addf %57, %62 : f32
    %cst_23 = arith.constant 2.000000e+00 : f32
    %64 = vector.broadcast %cst_23 : f32 to vector<8x1xf32>
    %65 = arith.subf %24, %64 : vector<8x1xf32>
    %66 = vector.shape_cast %65 : vector<8x1xf32> to vector<1x8x1xf32>
    %cst_24 = arith.constant dense<0.000000e+00> : vector<1xf32>
    %67 = vector.multi_reduction <add>, %66, %cst_24 [1, 2] : vector<1x8x1xf32> to vector<1xf32>
    %68 = vector.shape_cast %67 : vector<1xf32> to vector<1x1x1xf32>
    %69 = vector.extract %68[0, 0, 0] : f32 from vector<1x1x1xf32>
    %cst_25 = arith.constant 2.000000e+00 : f32
    %70 = arith.mulf %cst_25, %69 : f32
    %71 = arith.subf %63, %70 : f32
    %cst_26 = arith.constant 1.600000e+01 : f32
    %72 = arith.divf %71, %cst_26 : f32
    %c0_27 = arith.constant 0 : index
    %c0_28 = arith.constant 0 : index
    %73 = memref.load %arg2[%c0_27, %c0_28] : memref<1x1xf32, #tpu.memory_space<smem>>
    memref.store %72, %arg2[%c0_27, %c0_28] : memref<1x1xf32, #tpu.memory_space<smem>>
    return
  }
}

</mosaic_0001>

<bundles_post_ra>
// kernel: tpu_custom_call.1
= control target key start
LH: loop header
LB: loop body
LE: loop exit
PB: predicated region body
PF: predicated region fallthrough
CT: control target
= control target key end

     0   :  { %7 = vsyncpa [#allocation3], 0  ;;  %s466_s0 = inlined_call_operand.hbm [shape: f32[8,32], index: 0, kind: input, shape index: {}]   ;;  %s467_s1 = inlined_call_operand.hbm [shape: f32[8,32], index: 1, kind: input, shape index: {}]   ;;  %s468_s2 = inlined_call_operand.hbm [shape: f32[1,1], index: 2, kind: output, shape index: {}]  }
   0x1   :  { %8 = vsyncpa [#allocation6], 0 }
   0x2   :  { %9 = vsyncpa [#allocation4], 0  ;;  %s399_s9 = smov [#allocation2]   ;;  %s400_s11 = smov [#allocation5]  }
   0x3   :  { %s16_s10 = sshll.u32 %s399_s9, 4  ;;  %s26_s12 = sshll.u32 %s400_s11, 4  ;;  %s17_s10 = int_to_ptr.vmem [resolvable:$true] %s16_s10  ;;  %s27_s12 = int_to_ptr.vmem [resolvable:$true] %s26_s12 }
   0x4   :  { %s339_s15 = scalar_lea.hbm %s466_s0, 128 }
   0x5   :  { %p340_p0 = scmp.ne.s32.totalorder %s466_s0, %s339_s15  ;;  %p343_p1 = scmp.lt.u32.totalorder %s339_s15, %s466_s0 }
   0x7   :  { %p345_p2 = pnand %p343_p1, %p340_p0 }
   0x9   :  { %348 = shalt.err (!%p345_p2)
}
   0xa   :  { %s349_s20 = scalar_lea.vmem %s17_s10, 128  ;;  %p354_p4 = scmp.lt.s32.totalorder %s17_s10, %s17_s10 }
   0xb   :  { %p350_p3 = scmp.ne.s32.totalorder %s17_s10, %s349_s20  ;;  %p355_p5 = scmp.lt.s32.totalorder %s349_s20, %s349_s20 }
   0xd   :  { %p356_p6 = por %p355_p5, %p354_p4 }
   0xf   :  { %p357_p7 = pnand %p356_p6, %p350_p3 }
  0x11   :  { %360 = shalt.err (!%p357_p7)
}
  0x12   :  { %19 = dma.hbm_to_vmem [thread:$0]  %s466_s0, 128, %s17_s10, [#allocation3]  }
  0x13   :  { %s361_s25 = scalar_lea.hbm %s467_s1, 128 }
  0x14   :  { %p362_p8 = scmp.ne.s32.totalorder %s467_s1, %s361_s25  ;;  %p365_p9 = scmp.lt.u32.totalorder %s361_s25, %s467_s1 }
  0x16   :  { %p367_p10 = pnand %p365_p9, %p362_p8 }
  0x18   :  { %370 = shalt.err (!%p367_p10)
}
  0x19   :  { %s371_s30 = scalar_lea.vmem %s27_s12, 128  ;;  %p376_p12 = scmp.lt.s32.totalorder %s27_s12, %s27_s12 }
  0x1a   :  { %p372_p11 = scmp.ne.s32.totalorder %s27_s12, %s371_s30  ;;  %p377_p13 = scmp.lt.s32.totalorder %s371_s30, %s371_s30 }
  0x1c   :  { %p378_p0 = por %p377_p13, %p376_p12 }
  0x1e   :  { %p379_p1 = pnand %p378_p0, %p372_p11 }
  0x20   :  { %382 = shalt.err (!%p379_p1)
}
  0x21   :  { %29 = dma.hbm_to_vmem [thread:$0]  %s467_s1, 128, %s27_s12, [#allocation6]  }
  0x22   :  { %393 = dma.done.wait [#allocation3], 128  }
  0x23   :  { %394 = vsyncadd [#allocation3], 4294967168 }
  0x24   :  { %395 = dma.done.wait [#allocation6], 128  }
  0x25   :  { %396 = vsyncadd [#allocation6], 4294967168  ;;  %v37_v0 = vld [vmem:[#allocation2] sm:$0xff]  ;;  %vm40_vm0 = vcmask 261120   ;;  %v38_v1 = vld [vmem:[#allocation5] sm:$0xff]  ;;  %v401_v6 = vmov 0.0  }
  0x26   :  { %v39_v2 = vmul.f32 %v37_v0, %v37_v0  ;;  %v44_v3 = vmul.f32 %v38_v1, %v38_v1  ;;  %296 = vmatprep.subr.bf16.mxu0 %v401_v6  ;;  %302 = vmatprep.subr.bf16.mxu1 %v401_v6  ;;  %vm402_vm1 = vmmov 0   ;;  %vm197_vm2 = vcmask 64512   ;;  %s383_s12 = scalar_lea.hbm %s468_s2, 16 }
  0x27   :  { %298 = vmatprep.mubr.msk.bf16.mxu0 %vm402_vm1, %v401_v6  ;;  %304 = vmatprep.mubr.msk.bf16.mxu1 %vm402_vm1, %v401_v6  ;;  %vm236_vm3 = vcmask 57344   ;;  %vm223_vm4 = vcmask 7168   ;;  %p384_p2 = scmp.ne.s32.totalorder %s468_s2, %s383_s12  ;;  %p387_p3 = scmp.lt.u32.totalorder %s383_s12, %s468_s2 }
  0x28   :  { %v41_v4 = vsel %vm40_vm0, %v39_v2, 0.0  ;;  %v45_v5 = vsel %vm40_vm0, %v44_v3, 0.0 }
  0x29   :  { %42 = vadd.xlane.f32.xlu0 %v41_v4  ;;  %p389_p4 = pnand %p387_p3, %p384_p2 }
  0x2d   :  { %46 = vadd.xlane.f32.xlu0 %v45_v5 }
  0xb6   :  { %v43_v7 = vpop.xlane.xlu0 %42 }
  0xb7   :  { %v48_v8 = vmax.f32 %v43_v7, 1e-24 }
  0xb9   :  { %325 = vrsqrt.f32 %v48_v8 }
  0xba   :  { %v47_v9 = vpop.xlane.xlu0 %46 }
  0xbb   :  { %v52_v10 = vmax.f32 %v47_v9, 1e-24 }
  0xbd   :  { %327 = vrsqrt.f32 %v52_v10 }
  0xc3   :  { %v326_v11 = vpop.eup %325 }
  0xc4   :  { %v50_v12 = vmul.f32 1.4142135, %v326_v11 }
  0xc6   :  { %v51_v13 = vmul.f32 %v50_v12, %v37_v0 }
  0xc7   :  { %v328_v14 = vpop.eup %327 }
  0xc8   :  { %v54_v15 = vmul.f32 1.4142135, %v328_v14  ;;  %v60_v16 = vpack.c.bf16 %v51_v13, %v51_v13 }
  0xca   :  { %v63_v17 = vsel %vm40_vm0, %v60_v16, 0  ;;  %v55_v18 = vmul.f32 %v54_v15, %v38_v1 }
  0xcb   :  { %297 = vmatpush3.bf16.xpose.msra.mxu0 %v63_v17 }
  0xcc   :  { %v61_v19 = vpack.c.bf16 %v55_v18, %v55_v18  ;;  %v56_v20 = vmul.f32 %v55_v18, %v51_v13  ;;  %308 = vmatprep.subr.bf16.mxu0 %v401_v6 }
  0xce   :  { %v106_v21 = vsel %vm40_vm0, %v61_v19, 0  ;;  %v57_v22 = vsel %vm40_vm0, %v56_v20, 0.0 }
  0xcf   :  { %303 = vmatpush3.bf16.xpose.msra.mxu1 %v106_v21  ;;  %58 = vadd.xlane.f32.xlu0 %v57_v22 }
  0xd2   :  { %299 = vmatmul.mubr.msk.bf16.vlgmr.msra.gmra.mrb[0].mxu0 %vm40_vm0, %v60_v16 }
  0xd3   :  { %309 = vmatpush3.bf16.xpose.msra.mxu0 %v106_v21  ;;  %310 = vmatprep.mubr.msk.bf16.mxu0 %vm402_vm1, %v401_v6 }
  0xd6   :  { %305 = vmatmul.mubr.msk.bf16.vlgmr.msra.gmra.mrb[0].mxu1 %vm40_vm0, %v60_v16 }
  0xda   :  { %311 = vmatmul.mubr.msk.bf16.vlgmr.msra.gmra.mrb[4].mxu0 %vm40_vm0, %v61_v19 }
 0x15c   :  { %v59_v5 = vpop.xlane.xlu0 %58 }
 0x15d   :  { %v289_v7 = vadd.f32 -2.0, %v59_v5 }
 0x15f   :  { %v249_v9 = vsel %vm223_vm4, %v289_v7, 0.0 }
 0x1a5   :  { %v99_v23 = vpop.f32.mrb[0].mxu0 }
 0x1a6   :  { %v284_v24 = vadd.f32 -2.0, %v99_v23  ;;  %v300_v25 = vpop.f32.mrb[1].mxu0 }
 0x1a7   :  { %v102_v26 = vpop.f32.mrb[2].mxu0 }
 0x1a8   :  { %v189_v27 = vmul.f32 1.442695, %v284_v24  ;;  %v301_v28 = vpop.f32.mrb[3].mxu0 }
 0x1a9   :  { %v142_v29 = vpop.f32.mrb[0].mxu1 }
 0x1aa   :  { %329 = vpow2.f32 %v189_v27  ;;  %v285_v30 = vadd.f32 -2.0, %v142_v29  ;;  %v306_v31 = vpop.f32.mrb[1].mxu1 }
 0x1ab   :  { %v145_v32 = vpop.f32.mrb[2].mxu1 }
 0x1ac   :  { %v192_v33 = vmul.f32 1.442695, %v285_v30  ;;  %v307_v34 = vpop.f32.mrb[3].mxu1 }
 0x1ad   :  { %v182_v35 = vpop.f32.mrb[4].mxu0 }
 0x1ae   :  { %331 = vpow2.f32 %v192_v33  ;;  %v286_v36 = vadd.f32 -2.0, %v182_v35  ;;  %v312_v37 = vpop.f32.mrb[5].mxu0 }
 0x1af   :  { %v185_v38 = vpop.f32.mrb[6].mxu0 }
 0x1b0   :  { %v195_v39 = vmul.f32 1.442695, %v286_v36  ;;  %v313_v40 = vpop.f32.mrb[7].mxu0 }
 0x1b2   :  { %333 = vpow2.f32 %v195_v39 }
 0x1b4   :  { %v330_v41 = vpop.eup %329 }
 0x1b5   :  { %v198_v42 = vsel %vm197_vm2, %v330_v41, 0.0 }
 0x1b6   :  { %199 = vadd.xlane.f32.xlu1 %v198_v42 }
 0x1b8   :  { %v332_v43 = vpop.eup %331 }
 0x1b9   :  { %v201_v44 = vsel %vm197_vm2, %v332_v43, 0.0 }
 0x1ba   :  { %202 = vadd.xlane.f32.xlu1 %v201_v44  ;;  %v206_v45 = vrot.slane %v201_v44, 4 }
 0x1bc   :  { %v334_v46 = vpop.eup %333  ;;  %v207_v47 = vadd.f32 %v206_v45, %v201_v44 }
 0x1bd   :  { %v212_v48 = vsel %vm197_vm2, %v334_v46, 0.0 }
 0x1be   :  { %v213_v49 = vrot.slane %v212_v48, 4  ;;  %v208_v50 = vrot.slane %v207_v47, 2 }
 0x1c0   :  { %v214_v51 = vadd.f32 %v213_v49, %v212_v48  ;;  %v209_v52 = vadd.f32 %v208_v50, %v207_v47 }
 0x1c2   :  { %v215_v53 = vrot.slane %v214_v51, 2  ;;  %v210_v55 = vrot.slane %v209_v52, 1 }
 0x1c4   :  { %v216_v54 = vadd.f32 %v215_v53, %v214_v51  ;;  %v211_v57 = vadd.f32 %v210_v55, %v209_v52 }
 0x1c6   :  { %v217_v56 = vrot.slane %v216_v54, 1 }
 0x1c8   :  { %v218_v58 = vadd.f32 %v217_v56, %v216_v54 }
 0x1ca   :  { %v219_v59 = vadd.f32 %v218_v58, %v211_v57 }
 0x1cc   :  { %v288_v60 = vadd.f32 -1.0, %v219_v59 }
 0x1ce   :  { %335 = vlog2.f32 %v288_v60 }
 0x1d8   :  { %v336_v61 = vpop.eup %335 }
 0x1d9   :  { %v235_v62 = vmul.f32 0.6931472, %v336_v61 }
 0x1db   :  { %v237_v63 = vsel %vm236_vm3, %v235_v62, 0.0 }
 0x1dc   :  { %238 = vadd.xlane.f32.xlu0 %v237_v63 }
 0x243   :  { %v200_v0 = vpop.xlane.xlu1 %199 }
 0x247   :  { %v203_v1 = vpop.xlane.xlu1 %202 }
 0x248   :  { %v204_v2 = vadd.f32 %v203_v1, %v200_v0 }
 0x24a   :  { %v287_v3 = vadd.f32 -1.0, %v204_v2 }
 0x24c   :  { %337 = vlog2.f32 %v287_v3 }
 0x256   :  { %v338_v4 = vpop.eup %337 }
 0x257   :  { %v222_v6 = vmul.f32 0.6931472, %v338_v4 }
 0x259   :  { %v224_v8 = vsel %vm223_vm4, %v222_v6, 0.0 }
 0x25a   :  { %225 = vadd.xlane.f32.xlu1 %v224_v8 }
 0x25e   :  { %250 = vadd.xlane.f32.xlu1 %v249_v9 }
 0x269   :  { %v239_v10 = vpop.xlane.xlu0 %238 }
 0x26a   :  { %v240_v11 = vrot.slane %v239_v10, 4 }
 0x26c   :  { %v241_v12 = vadd.f32 %v240_v11, %v239_v10 }
 0x26e   :  { %v242_v13 = vrot.slane %v241_v12, 2 }
 0x270   :  { %v243_v17 = vadd.f32 %v242_v13, %v241_v12 }
 0x272   :  { %v244_v23 = vrot.slane %v243_v17, 1 }
 0x274   :  { %v245_v28 = vadd.f32 %v244_v23, %v243_v17 }
 0x2e7   :  { %v226_v14 = vpop.xlane.xlu1 %225 }
 0x2e8   :  { %v227_v15 = vrot.slane %v226_v14, 4 }
 0x2ea   :  { %v228_v16 = vadd.f32 %v227_v15, %v226_v14 }
 0x2eb   :  { %v251_v18 = vpop.xlane.xlu1 %250 }
 0x2ec   :  { %v229_v19 = vrot.slane %v228_v16, 2  ;;  %v252_v20 = vrot.slane %v251_v18, 4 }
 0x2ee   :  { %v253_v21 = vadd.f32 %v252_v20, %v251_v18  ;;  %v230_v22 = vadd.f32 %v229_v19, %v228_v16 }
 0x2f0   :  { %v254_v24 = vrot.slane %v253_v21, 2  ;;  %v231_v25 = vrot.slane %v230_v22, 1 }
 0x2f2   :  { %v255_v26 = vadd.f32 %v254_v24, %v253_v21  ;;  %v232_v27 = vadd.f32 %v231_v25, %v230_v22 }
 0x2f4   :  { %314 = vpush %v232_v27  ;;  %v256_v29 = vrot.slane %v255_v26, 1 }
 0x2f5   :  { %316 = vpush %v245_v28 }
 0x2f6   :  { %v257_v30 = vadd.f32 %v256_v29, %v255_v26 }
 0x2f8   :  { %318 = vpush %v257_v30 }
 0x325   :  { %s315_s1 = spop %314 }
 0x326   :  { %s317_s4 = spop %316 }
 0x327   :  { %s247_s6 = sadd.f32 %s317_s4, %s315_s1 }
 0x329   :  { %s319_s5 = spop %318 }
 0x32a   :  { %s259_s7 = smul.f32 2.0, %s319_s5 }
 0x32c   :  { %s260_s8 = ssub.f32 %s247_s6, %s259_s7 }
 0x32e   :  { %s263_s9 = smul.f32 0.0625, %s260_s8 }
 0x330   :  { %265 = sst [smem:[#allocation7]] %s263_s9 }
 0x331   :  { %392 = shalt.err (!%p389_p4)
}
 0x332   :  { %s403_s17 = smov [#allocation7]  }
 0x333   :  { %273 = dma.smem_to_hbm %s403_s17, 16, %s468_s2, [#allocation4]  }
 0x334   :  { %397 = dma.done.wait [#allocation4], 16  }
 0x335   :  { %398 = vsyncadd [#allocation4], 4294967280 }
 0x336   :  { %277 = sfence }
 0x337   :  { %278 = vsyncpa [#allocation3], 1 }
 0x338   :  { %279 = vsyncpa [#allocation6], 1 }
 0x339   :  { %280 = vsyncpa [#allocation4], 1 }

</bundles_post_ra>
